<compile_context>
chip_gen: v6e
topology: v6e:2x2x1
jax: 0.10.0
libtpu: 0.0.40
codegen_flags: <defaults>
</compile_context>

<pallas_src>
import functools

import numpy as np
import jax
import jax.numpy as jnp
from jax import lax
from jax.experimental import pallas as pl
from jax.experimental.pallas import tpu as pltpu

_BIG = 1e30  # finite "not in this class" sentinel (cheaper/safer than inf)


def nn_head_kernel(x_ref, db_ref, pen_ref, out_ref, *, num_classes):
    """logits[q, c] = -min_{n in class c} ||normalize(x_q) - normalize(db_n)||_2.

    x_ref   : [Qp, Dp] f32  query embeddings (zero-padded rows/features)
    db_ref  : [Np, Dp] f32  database embeddings (zero-padded rows/features)
    pen_ref : [C,  Np] f32  additive penalty: 0 if labels_db[n]==classes[c] else -BIG
                            (padded db rows are -BIG for every class)
    out_ref : [Qp, Cp] f32  logits (padded; real block is [:Q, :C])
    """
    eps2 = jnp.float32(1e-24)  # (F.normalize eps=1e-12)^2

    x = x_ref[...]
    db = db_ref[...]

    # L2-normalize rows: x / max(||x||, eps) == x * rsqrt(max(||x||^2, eps^2)).
    # rsqrt goes to the EUP slot; multiply replaces a vector divide.
    x = x * lax.rsqrt(jnp.maximum(jnp.sum(x * x, axis=1, keepdims=True), eps2))
    db = db * lax.rsqrt(jnp.maximum(jnp.sum(db * db, axis=1, keepdims=True), eps2))

    # Cosine similarity matrix on the MXU; (1,1) contraction avoids a db.T copy.
    sim = lax.dot_general(x, db, dimension_numbers=(((1,), (1,)), ((), ())),
                          preferred_element_type=jnp.float32)        # [Qp, Np]

    # Per-class nearest neighbor: max similarity within the class (additive
    # -BIG penalty masks out-of-class / padded columns), then convert to
    # distance only on the tiny per-class result:
    #   min_dist_c = sqrt(max(2 - 2 * max_sim_c, 0)).
    # Statically unrolled over C (small, trace-time constant); each step is a
    # [Qp, Np] add + lane reduce, N stays on lanes, no [Q, C, N] intermediate.
    pen = pen_ref[...]                                                # [C, Np]
    q_pad, c_pad = out_ref.shape
    col_idx = lax.broadcasted_iota(jnp.int32, (q_pad, c_pad), 1)
    out = jnp.zeros((q_pad, c_pad), jnp.float32)
    for c in range(num_classes):
        max_sim_c = jnp.max(sim + pen[c:c + 1, :], axis=1, keepdims=True)  # [Qp, 1]
        min_dist_c = jnp.sqrt(jnp.maximum(2.0 - 2.0 * max_sim_c, 0.0))     # [Qp, 1]
        out = jnp.where(col_idx == c, -min_dist_c, out)
    out_ref[...] = out  # single lane-dense full store


def _round_up(v, m):
    return (v + m - 1) // m * m


def nn_head_forward(x, embeddings_db, labels_db_np):
    """JAX/Pallas equivalent of NNHead.forward after fit(embeddings_db, labels_db).

    fit()'s database accumulation and torch.unique(labels) are host-side prep on
    concrete labels (no in-kernel equivalent needed).
    """
    classes = np.unique(labels_db_np)               # sorted unique classes
    num_classes = int(classes.shape[0])

    q, d = x.shape
    n, d_db = embeddings_db.shape
    assert d == d_db

    # Layout prep (outside the kernel): lane axes -> multiples of 128,
    # sublane axes -> multiples of 8.
    d_pad = _round_up(d, 128)
    n_pad = _round_up(n, 128)
    q_pad = _round_up(q, 8)
    c_pad = _round_up(num_classes, 128)

    # Additive per-class penalty [C, Np]: 0 where db row belongs to class c,
    # -BIG elsewhere (including padded db rows).  np.unique guarantees every
    # class row is non-empty, so the torch "empty class -> inf" branch can
    # never trigger.
    penalty = np.full((num_classes, n_pad), -_BIG, dtype=np.float32)
    penalty[:, :n] = np.where(labels_db_np[None, :] == classes[:, None],
                              0.0, -_BIG).astype(np.float32)
    penalty = jnp.asarray(penalty)

    x_p = jnp.pad(x.astype(jnp.float32), ((0, q_pad - q), (0, d_pad - d)))
    db_p = jnp.pad(embeddings_db.astype(jnp.float32),
                   ((0, n_pad - n), (0, d_pad - d)))

    kernel = functools.partial(nn_head_kernel, num_classes=num_classes)
    out_padded = pl.pallas_call(
        kernel,
        out_shape=jax.ShapeDtypeStruct((q_pad, c_pad), jnp.float32),
        in_specs=[
            pl.BlockSpec(memory_space=pltpu.MemorySpace.VMEM),
            pl.BlockSpec(memory_space=pltpu.MemorySpace.VMEM),
            pl.BlockSpec(memory_space=pltpu.MemorySpace.VMEM),
        ],
        out_specs=pl.BlockSpec(memory_space=pltpu.MemorySpace.VMEM),
    )(x_p, db_p, penalty)

    return out_padded[:q, :num_classes]


def nn_head_reference(x, embeddings_db, labels_db_np):
    """Pure-JAX reference (mirrors torch: normalize -> cdist -> per-class min -> negate)."""
    eps = 1e-12
    xn = x / jnp.maximum(jnp.linalg.norm(x, axis=1, keepdims=True), eps)
    dbn = embeddings_db / jnp.maximum(
        jnp.linalg.norm(embeddings_db, axis=1, keepdims=True), eps)
    dist = jnp.sqrt(jnp.maximum(
        jnp.sum(xn * xn, axis=1, keepdims=True)
        + jnp.sum(dbn * dbn, axis=1)[None, :]
        - 2.0 * xn @ dbn.T, 0.0))
    classes = np.unique(labels_db_np)
    cols = []
    for c in classes:
        m = labels_db_np == c
        cols.append(jnp.min(dist[:, m], axis=1))
    return -jnp.stack(cols, axis=1)


if __name__ == "__main__":
    key = jax.random.PRNGKey(0)
    k_db, k_lab, k_q = jax.random.split(key, 3)

    N, Q, D, C = 16, 8, 32, 4  # database size, query batch, feature dim, classes

    # Synthetic "fit" data (deterministic): database embeddings + integer labels.
    embeddings_db = jax.random.normal(k_db, (N, D), dtype=jnp.float32)
    labels_db_np = np.asarray(
        jax.random.randint(k_lab, (N,), 0, C, dtype=jnp.int32))

    # Query batch.
    x = jax.random.normal(k_q, (Q, D), dtype=jnp.float32)

    logits = nn_head_forward(x, embeddings_db, labels_db_np)
    logits = jax.block_until_ready(logits)

    ref = nn_head_reference(x, embeddings_db, labels_db_np)
    np.testing.assert_allclose(np.asarray(logits), np.asarray(ref),
                               rtol=1e-5, atol=1e-5)

    print("KERNEL_OK")
</pallas_src>

<mosaic_0001>
module attributes {stable_mosaic.version = 11 : i64} {
  func.func @nn_head_kernel(%arg0: memref<8x128xf32, #tpu.memory_space<vmem>>, %arg1: memref<128x128xf32, #tpu.memory_space<vmem>>, %arg2: memref<4x128xf32, #tpu.memory_space<vmem>>, %arg3: memref<8x128xf32, #tpu.memory_space<vmem>>) attributes {dimension_semantics = [], scalar_prefetch = 0 : i64, scratch_operands = 0 : i64, tpu.core_type = #tpu.core_type<tc>} {
    %c0 = arith.constant 0 : index
    %c0_0 = arith.constant 0 : index
    %0 = vector.load %arg0[%c0, %c0_0] : memref<8x128xf32, #tpu.memory_space<vmem>>, vector<8x128xf32>
    %c0_1 = arith.constant 0 : index
    %c0_2 = arith.constant 0 : index
    %1 = vector.load %arg1[%c0_1, %c0_2] : memref<128x128xf32, #tpu.memory_space<vmem>>, vector<128x128xf32>
    %2 = arith.mulf %0, %0 : vector<8x128xf32>
    %cst = arith.constant dense<0.000000e+00> : vector<8xf32>
    %3 = vector.multi_reduction <add>, %2, %cst [1] : vector<8x128xf32> to vector<8xf32>
    %4 = vector.shape_cast %3 : vector<8xf32> to vector<8x1xf32>
    %cst_3 = arith.constant 1.000000e-24 : f32
    %5 = vector.broadcast %cst_3 : f32 to vector<8x1xf32>
    %6 = arith.maximumf %4, %5 : vector<8x1xf32>
    %7 = math.rsqrt %6 : vector<8x1xf32>
    %8 = vector.broadcast %7 : vector<8x1xf32> to vector<8x128xf32>
    %9 = arith.mulf %0, %8 : vector<8x128xf32>
    %10 = arith.mulf %1, %1 : vector<128x128xf32>
    %cst_4 = arith.constant dense<0.000000e+00> : vector<128xf32>
    %11 = vector.multi_reduction <add>, %10, %cst_4 [1] : vector<128x128xf32> to vector<128xf32>
    %12 = vector.shape_cast %11 : vector<128xf32> to vector<128x1xf32>
    %cst_5 = arith.constant 1.000000e-24 : f32
    %13 = vector.broadcast %cst_5 : f32 to vector<128x1xf32>
    %14 = arith.maximumf %12, %13 : vector<128x1xf32>
    %15 = math.rsqrt %14 : vector<128x1xf32>
    %16 = vector.broadcast %15 : vector<128x1xf32> to vector<128x128xf32>
    %17 = arith.mulf %1, %16 : vector<128x128xf32>
    %cst_6 = arith.constant dense<0.000000e+00> : vector<8x128xf32>
    %18 = tpu.matmul %9, %17, %cst_6 {dimension_numbers = #tpu.dot_dimension_numbers<[1], [1], [0], [0], [0, 0, 1, 0], [], []>} : vector<8x128xf32>, vector<128x128xf32>, vector<8x128xf32> -> vector<8x128xf32>
    %c0_7 = arith.constant 0 : index
    %c0_8 = arith.constant 0 : index
    %19 = vector.load %arg2[%c0_7, %c0_8] : memref<4x128xf32, #tpu.memory_space<vmem>>, vector<4x128xf32>
    %20 = tpu.iota {dimensions = array<i32: 1>} : vector<8x128xi32>
    %cst_9 = arith.constant 0.000000e+00 : f32
    %21 = vector.broadcast %cst_9 : f32 to vector<8x128xf32>
    %22 = vector.extract_strided_slice %19 {offsets = [0, 0], sizes = [1, 128], strides = [1, 1]} : vector<4x128xf32> to vector<1x128xf32>
    %23 = vector.broadcast %22 : vector<1x128xf32> to vector<8x128xf32>
    %24 = arith.addf %18, %23 : vector<8x128xf32>
    %cst_10 = arith.constant dense<0xFF800000> : vector<8xf32>
    %25 = vector.multi_reduction <maximumf>, %24, %cst_10 [1] : vector<8x128xf32> to vector<8xf32>
    %26 = vector.shape_cast %25 : vector<8xf32> to vector<8x1xf32>
    %cst_11 = arith.constant 2.000000e+00 : f32
    %27 = vector.broadcast %cst_11 : f32 to vector<8x1xf32>
    %28 = arith.mulf %27, %26 : vector<8x1xf32>
    %cst_12 = arith.constant 2.000000e+00 : f32
    %29 = vector.broadcast %cst_12 : f32 to vector<8x1xf32>
    %30 = arith.subf %29, %28 : vector<8x1xf32>
    %cst_13 = arith.constant 0.000000e+00 : f32
    %31 = vector.broadcast %cst_13 : f32 to vector<8x1xf32>
    %32 = arith.maximumf %30, %31 : vector<8x1xf32>
    %33 = math.sqrt %32 : vector<8x1xf32>
    %c0_i32 = arith.constant 0 : i32
    %34 = vector.broadcast %c0_i32 : i32 to vector<8x128xi32>
    %35 = arith.cmpi eq, %20, %34 : vector<8x128xi32>
    %cst_14 = arith.constant 0.000000e+00 : f32
    %36 = vector.broadcast %cst_14 : f32 to vector<8x1xf32>
    %37 = arith.subf %36, %33 : vector<8x1xf32>
    %38 = vector.shape_cast %37 : vector<8x1xf32> to vector<8x1xf32>
    %39 = vector.broadcast %38 : vector<8x1xf32> to vector<8x128xf32>
    %40 = arith.select %35, %39, %21 : vector<8x128xi1>, vector<8x128xf32>
    %41 = vector.extract_strided_slice %19 {offsets = [1, 0], sizes = [1, 128], strides = [1, 1]} : vector<4x128xf32> to vector<1x128xf32>
    %42 = vector.broadcast %41 : vector<1x128xf32> to vector<8x128xf32>
    %43 = arith.addf %18, %42 : vector<8x128xf32>
    %cst_15 = arith.constant dense<0xFF800000> : vector<8xf32>
    %44 = vector.multi_reduction <maximumf>, %43, %cst_15 [1] : vector<8x128xf32> to vector<8xf32>
    %45 = vector.shape_cast %44 : vector<8xf32> to vector<8x1xf32>
    %cst_16 = arith.constant 2.000000e+00 : f32
    %46 = vector.broadcast %cst_16 : f32 to vector<8x1xf32>
    %47 = arith.mulf %46, %45 : vector<8x1xf32>
    %cst_17 = arith.constant 2.000000e+00 : f32
    %48 = vector.broadcast %cst_17 : f32 to vector<8x1xf32>
    %49 = arith.subf %48, %47 : vector<8x1xf32>
    %cst_18 = arith.constant 0.000000e+00 : f32
    %50 = vector.broadcast %cst_18 : f32 to vector<8x1xf32>
    %51 = arith.maximumf %49, %50 : vector<8x1xf32>
    %52 = math.sqrt %51 : vector<8x1xf32>
    %c1_i32 = arith.constant 1 : i32
    %53 = vector.broadcast %c1_i32 : i32 to vector<8x128xi32>
    %54 = arith.cmpi eq, %20, %53 : vector<8x128xi32>
    %cst_19 = arith.constant 0.000000e+00 : f32
    %55 = vector.broadcast %cst_19 : f32 to vector<8x1xf32>
    %56 = arith.subf %55, %52 : vector<8x1xf32>
    %57 = vector.shape_cast %56 : vector<8x1xf32> to vector<8x1xf32>
    %58 = vector.broadcast %57 : vector<8x1xf32> to vector<8x128xf32>
    %59 = arith.select %54, %58, %40 : vector<8x128xi1>, vector<8x128xf32>
    %60 = vector.extract_strided_slice %19 {offsets = [2, 0], sizes = [1, 128], strides = [1, 1]} : vector<4x128xf32> to vector<1x128xf32>
    %61 = vector.broadcast %60 : vector<1x128xf32> to vector<8x128xf32>
    %62 = arith.addf %18, %61 : vector<8x128xf32>
    %cst_20 = arith.constant dense<0xFF800000> : vector<8xf32>
    %63 = vector.multi_reduction <maximumf>, %62, %cst_20 [1] : vector<8x128xf32> to vector<8xf32>
    %64 = vector.shape_cast %63 : vector<8xf32> to vector<8x1xf32>
    %cst_21 = arith.constant 2.000000e+00 : f32
    %65 = vector.broadcast %cst_21 : f32 to vector<8x1xf32>
    %66 = arith.mulf %65, %64 : vector<8x1xf32>
    %cst_22 = arith.constant 2.000000e+00 : f32
    %67 = vector.broadcast %cst_22 : f32 to vector<8x1xf32>
    %68 = arith.subf %67, %66 : vector<8x1xf32>
    %cst_23 = arith.constant 0.000000e+00 : f32
    %69 = vector.broadcast %cst_23 : f32 to vector<8x1xf32>
    %70 = arith.maximumf %68, %69 : vector<8x1xf32>
    %71 = math.sqrt %70 : vector<8x1xf32>
    %c2_i32 = arith.constant 2 : i32
    %72 = vector.broadcast %c2_i32 : i32 to vector<8x128xi32>
    %73 = arith.cmpi eq, %20, %72 : vector<8x128xi32>
    %cst_24 = arith.constant 0.000000e+00 : f32
    %74 = vector.broadcast %cst_24 : f32 to vector<8x1xf32>
    %75 = arith.subf %74, %71 : vector<8x1xf32>
    %76 = vector.shape_cast %75 : vector<8x1xf32> to vector<8x1xf32>
    %77 = vector.broadcast %76 : vector<8x1xf32> to vector<8x128xf32>
    %78 = arith.select %73, %77, %59 : vector<8x128xi1>, vector<8x128xf32>
    %79 = vector.extract_strided_slice %19 {offsets = [3, 0], sizes = [1, 128], strides = [1, 1]} : vector<4x128xf32> to vector<1x128xf32>
    %80 = vector.broadcast %79 : vector<1x128xf32> to vector<8x128xf32>
    %81 = arith.addf %18, %80 : vector<8x128xf32>
    %cst_25 = arith.constant dense<0xFF800000> : vector<8xf32>
    %82 = vector.multi_reduction <maximumf>, %81, %cst_25 [1] : vector<8x128xf32> to vector<8xf32>
    %83 = vector.shape_cast %82 : vector<8xf32> to vector<8x1xf32>
    %cst_26 = arith.constant 2.000000e+00 : f32
    %84 = vector.broadcast %cst_26 : f32 to vector<8x1xf32>
    %85 = arith.mulf %84, %83 : vector<8x1xf32>
    %cst_27 = arith.constant 2.000000e+00 : f32
    %86 = vector.broadcast %cst_27 : f32 to vector<8x1xf32>
    %87 = arith.subf %86, %85 : vector<8x1xf32>
    %cst_28 = arith.constant 0.000000e+00 : f32
    %88 = vector.broadcast %cst_28 : f32 to vector<8x1xf32>
    %89 = arith.maximumf %87, %88 : vector<8x1xf32>
    %90 = math.sqrt %89 : vector<8x1xf32>
    %c3_i32 = arith.constant 3 : i32
    %91 = vector.broadcast %c3_i32 : i32 to vector<8x128xi32>
    %92 = arith.cmpi eq, %20, %91 : vector<8x128xi32>
    %cst_29 = arith.constant 0.000000e+00 : f32
    %93 = vector.broadcast %cst_29 : f32 to vector<8x1xf32>
    %94 = arith.subf %93, %90 : vector<8x1xf32>
    %95 = vector.shape_cast %94 : vector<8x1xf32> to vector<8x1xf32>
    %96 = vector.broadcast %95 : vector<8x1xf32> to vector<8x128xf32>
    %97 = arith.select %92, %96, %78 : vector<8x128xi1>, vector<8x128xf32>
    %c0_30 = arith.constant 0 : index
    %c0_31 = arith.constant 0 : index
    %98 = vector.load %arg3[%c0_30, %c0_31] : memref<8x128xf32, #tpu.memory_space<vmem>>, vector<8x128xf32>
    tpu.vector_store %arg3[%c0_30, %c0_31], %97 {strides = array<i32>} : memref<8x128xf32, #tpu.memory_space<vmem>>, vector<8x128xf32>,
    return
  }
}

</mosaic_0001>

<bundles_post_ra>
// kernel: tpu_custom_call.1
= control target key start
LH: loop header
LB: loop body
LE: loop exit
PB: predicated region body
PF: predicated region fallthrough
CT: control target
= control target key end

     0   :  { %8 = vsyncpa [#allocation3], 0  ;;  %s672_s0 = inlined_call_operand.hbm [shape: f32[8,128], index: 0, kind: input, shape index: {}]   ;;  %s673_s1 = inlined_call_operand.hbm [shape: f32[128,128], index: 1, kind: input, shape index: {}]   ;;  %s674_s2 = inlined_call_operand.hbm [shape: f32[4,128], index: 2, kind: input, shape index: {}]   ;;  %s675_s3 = inlined_call_operand.hbm [shape: f32[8,128], index: 3, kind: output, shape index: {}]  }
   0x1   :  { %9 = vsyncpa [#allocation6], 0 }
   0x2   :  { %10 = vsyncpa [#allocation4], 0  ;;  %s529_s12 = smov [#allocation5]  }
   0x3   :  { %s26_s13 = sshll.u32 %s529_s12, 4  ;;  %s27_s13 = int_to_ptr.vmem [resolvable:$true] %s26_s13 }
   0x4   :  { %s451_s14 = scalar_lea.vmem %s27_s13, 2048  ;;  %p456_p1 = scmp.lt.s32.totalorder %s27_s13, %s27_s13 }
   0x5   :  { %p452_p0 = scmp.ne.s32.totalorder %s27_s13, %s451_s14  ;;  %p457_p2 = scmp.lt.s32.totalorder %s451_s14, %s451_s14 }
   0x7   :  { %p458_p3 = por %p457_p2, %p456_p1 }
   0x9   :  { %p459_p4 = pnand %p458_p3, %p452_p0 }
   0xb   :  { %462 = shalt.err (!%p459_p4)
}
   0xc   :  { %s530_s15 = smov 128   ;;  %s531_s16 = smov 8  }
   0xd   :  { %32 = dma.hbm_to_vmem [thread:$0]  %s673_s1, 2048, %s27_s13, [#allocation6], %s530_s15, %s530_s15, %s531_s16  }
   0xe   :  { %s532_s19 = smov [#allocation2]   ;;  %s533_s21 = smov [#allocation7]  }
   0xf   :  { %s17_s20 = sshll.u32 %s532_s19, 4  ;;  %s39_s22 = sshll.u32 %s533_s21, 4  ;;  %s18_s20 = int_to_ptr.vmem [resolvable:$true] %s17_s20  ;;  %s40_s22 = int_to_ptr.vmem [resolvable:$true] %s39_s22 }
  0x10   :  { %s471_s23 = scalar_lea.vmem %s18_s20, 128  ;;  %p476_p6 = scmp.lt.s32.totalorder %s18_s20, %s18_s20 }
  0x11   :  { %p472_p5 = scmp.ne.s32.totalorder %s18_s20, %s471_s23  ;;  %p477_p7 = scmp.lt.s32.totalorder %s471_s23, %s471_s23 }
  0x13   :  { %p478_p8 = por %p477_p7, %p476_p6 }
  0x15   :  { %p479_p9 = pnand %p478_p8, %p472_p5 }
  0x17   :  { %482 = shalt.err (!%p479_p9)
}
  0x18   :  { %20 = dma.hbm_to_vmem [thread:$0]  %s672_s0, 128, %s18_s20, [#allocation3]  }
  0x19   :  { %s491_s26 = scalar_lea.vmem %s40_s22, 64  ;;  %p496_p11 = scmp.lt.s32.totalorder %s40_s22, %s40_s22 }
  0x1a   :  { %p492_p10 = scmp.ne.s32.totalorder %s40_s22, %s491_s26  ;;  %p497_p12 = scmp.lt.s32.totalorder %s491_s26, %s491_s26 }
  0x1c   :  { %p498_p13 = por %p497_p12, %p496_p11 }
  0x1e   :  { %p499_p0 = pnand %p498_p13, %p492_p10 }
  0x20   :  { %502 = shalt.err (!%p499_p0)
}
  0x21   :  { %42 = dma.hbm_to_vmem [thread:$0]  %s674_s2, 64, %s40_s22, [#allocation6]  }
  0x22   :  { %523 = dma.done.wait [#allocation3], 128  }
  0x23   :  { %524 = vsyncadd [#allocation3], 4294967168 }
  0x24   :  { %525 = dma.done.wait [#allocation6], 2112  }
  0x25   :  { %526 = vsyncadd [#allocation6], 4294965184  ;;  %v566_v0 = vld [vmem:[#allocation5 + $0x78] sm:$0xff]  ;;  %v568_v1 = vld [vmem:[#allocation5 + $0x70] sm:$0xff]  ;;  %v534_v30 = vmov 0.0   ;;  %vm535_vm0 = vmmov 0  }
  0x26   :  { %v570_v2 = vld [vmem:[#allocation5 + $0x68] sm:$0xff]  ;;  %v90_v3 = vmul.f32 %v566_v0, %v566_v0  ;;  %v576_v5 = vld [vmem:[#allocation5 + $0x60] sm:$0xff]  ;;  %v89_v6 = vmul.f32 %v568_v1, %v568_v1  ;;  %v582_v8 = vld [vmem:[#allocation5 + $0x58] sm:$0xff]  ;;  %358 = vmatprep.subr.mxu0 %v534_v30  ;;  %390 = vmatprep.mubr.msk.f32.mxu0 %vm535_vm0, %v534_v30  ;;  %s536_s0 = smov [#allocation8]  }
  0x27   :  { %v88_v4 = vmul.f32 %v570_v2, %v570_v2  ;;  %v87_v7 = vmul.f32 %v576_v5, %v576_v5  ;;  %v584_v9 = vld [vmem:[#allocation5 + $0x50] sm:$0xff]  ;;  %v86_v10 = vmul.f32 %v582_v8, %v582_v8  ;;  %v590_v12 = vld [vmem:[#allocation5 + $0x48] sm:$0xff]  ;;  %v592_v13 = vld [vmem:[#allocation5 + $0x40] sm:$0xff]  ;;  %s331_s2 = sshll.u32 %s536_s0, 4  ;;  %s332_s2 = int_to_ptr.vmem [resolvable:$true] %s331_s2 }
  0x28   :  { %121 = vadd.xlane.f32.xlu0 %v90_v3  ;;  %v85_v11 = vmul.f32 %v584_v9, %v584_v9  ;;  %v84_v14 = vmul.f32 %v590_v12, %v590_v12  ;;  %v83_v15 = vmul.f32 %v592_v13, %v592_v13  ;;  %v598_v16 = vld [vmem:[#allocation5 + $0x38] sm:$0xff]  ;;  %v600_v17 = vld [vmem:[#allocation5 + $0x30] sm:$0xff]  ;;  %v606_v20 = vld [vmem:[#allocation5 + $0x28] sm:$0xff]  ;;  %s503_s28 = scalar_lea.vmem %s332_s2, 128  ;;  %p508_p2 = scmp.lt.s32.totalorder %s332_s2, %s332_s2 }
  0x29   :  { %117 = vadd.xlane.f32.xlu1 %v88_v4  ;;  %v82_v18 = vmul.f32 %v598_v16, %v598_v16  ;;  %v81_v19 = vmul.f32 %v600_v17, %v600_v17  ;;  %v608_v21 = vld [vmem:[#allocation5 + $0x20] sm:$0xff]  ;;  %v80_v22 = vmul.f32 %v606_v20, %v606_v20  ;;  %v614_v24 = vld [vmem:[#allocation5 + $0x18] sm:$0xff]  ;;  %v616_v25 = vld [vmem:[#allocation5 + $0x10] sm:$0xff]  ;;  %p504_p1 = scmp.ne.s32.totalorder %s332_s2, %s503_s28  ;;  %p509_p3 = scmp.lt.s32.totalorder %s503_s28, %s503_s28 }
  0x2a   :  { %v79_v23 = vmul.f32 %v608_v21, %v608_v21  ;;  %v78_v26 = vmul.f32 %v614_v24, %v614_v24  ;;  %v77_v27 = vmul.f32 %v616_v25, %v616_v25  ;;  %v622_v28 = vld [vmem:[#allocation5 + $0x8] sm:$0xff]  ;;  %v624_v29 = vld [vmem:[#allocation5] sm:$0xff]  ;;  %v631_v33 = vld [vmem:[#allocation2] sm:$0xff] }
  0x2b   :  { %v76_v31 = vmul.f32 %v622_v28, %v622_v28  ;;  %v75_v32 = vmul.f32 %v624_v29, %v624_v29  ;;  %v69_v34 = vmul.f32 %v631_v33, %v631_v33  ;;  %p510_p4 = por %p509_p3, %p508_p2 }
  0x2c   :  { %119 = vadd.xlane.f32.xlu0 %v89_v6 }
  0x2d   :  { %115 = vadd.xlane.f32.xlu1 %v87_v7  ;;  %p511_p5 = pnand %p510_p4, %p504_p1 }
  0x30   :  { %113 = vadd.xlane.f32.xlu0 %v86_v10 }
  0x31   :  { %111 = vadd.xlane.f32.xlu1 %v85_v11 }
  0x34   :  { %109 = vadd.xlane.f32.xlu0 %v84_v14 }
  0x35   :  { %107 = vadd.xlane.f32.xlu1 %v83_v15 }
  0x38   :  { %105 = vadd.xlane.f32.xlu0 %v82_v18 }
  0x39   :  { %103 = vadd.xlane.f32.xlu1 %v81_v19 }
  0x3c   :  { %101 = vadd.xlane.f32.xlu0 %v80_v22 }
  0x3d   :  { %99 = vadd.xlane.f32.xlu1 %v79_v23 }
  0x40   :  { %97 = vadd.xlane.f32.xlu0 %v78_v26 }
  0x41   :  { %95 = vadd.xlane.f32.xlu1 %v77_v27 }
  0x44   :  { %93 = vadd.xlane.f32.xlu0 %v76_v31 }
  0x45   :  { %91 = vadd.xlane.f32.xlu1 %v75_v32 }
  0x48   :  { %70 = vadd.xlane.f32.xlu0 %v69_v34 }
  0xb1   :  { %v122_v35 = vpop.xlane.xlu0 %121 }
  0xb2   :  { %v118_v36 = vpop.xlane.xlu1 %117  ;;  %v138_v37 = vmax.f32 %v122_v35, 1e-24 }
  0xb3   :  { %v136_v38 = vmax.f32 %v118_v36, 1e-24 }
  0xb4   :  { %401 = vrsqrt.f32 %v138_v37 }
  0xb5   :  { %v120_v39 = vpop.xlane.xlu0 %119  ;;  %403 = vrsqrt.f32 %v136_v38 }
  0xb6   :  { %v116_v40 = vpop.xlane.xlu1 %115  ;;  %v137_v41 = vmax.f32 %v120_v39, 1e-24 }
  0xb7   :  { %v135_v42 = vmax.f32 %v116_v40, 1e-24 }
  0xb8   :  { %405 = vrsqrt.f32 %v137_v41 }
  0xb9   :  { %v114_v43 = vpop.xlane.xlu0 %113  ;;  %407 = vrsqrt.f32 %v135_v42 }
  0xba   :  { %v134_v44 = vmax.f32 %v114_v43, 1e-24  ;;  %v112_v45 = vpop.xlane.xlu1 %111 }
  0xbb   :  { %v133_v46 = vmax.f32 %v112_v45, 1e-24 }
  0xbc   :  { %409 = vrsqrt.f32 %v134_v44 }
  0xbd   :  { %v110_v48 = vpop.xlane.xlu0 %109  ;;  %411 = vrsqrt.f32 %v133_v46 }
  0xbe   :  { %v132_v51 = vmax.f32 %v110_v48, 1e-24  ;;  %v108_v53 = vpop.xlane.xlu1 %107 }
  0xbf   :  { %v131_v56 = vmax.f32 %v108_v53, 1e-24 }
  0xc0   :  { %413 = vrsqrt.f32 %v132_v51 }
  0xc1   :  { %v402_v47 = vpop.eup %401  ;;  %v106_v58 = vpop.xlane.xlu0 %105  ;;  %415 = vrsqrt.f32 %v131_v56 }
  0xc2   :  { %v170_v49 = vmul.f32 %v402_v47, %v566_v0  ;;  %v404_v50 = vpop.eup %403  ;;  %v130_v60 = vmax.f32 %v106_v58, 1e-24  ;;  %v104_v62 = vpop.xlane.xlu1 %103  ;;  %v241_v47 = vld [vmem:[#allocation7] sm:$0xf] }
  0xc3   :  { %v168_v55 = vmul.f32 %v404_v50, %v570_v2  ;;  %v129_v0 = vmax.f32 %v104_v62, 1e-24 }
  0xc4   :  { %359 = vmatpush3.xpose.msra.mxu0 %v170_v49  ;;  %417 = vrsqrt.f32 %v130_v60 }
  0xc5   :  { %v406_v52 = vpop.eup %405  ;;  %360 = vmatprep.subr.mxu0 %v534_v30  ;;  %v102_v2 = vpop.xlane.xlu0 %101  ;;  %419 = vrsqrt.f32 %v129_v0 }
  0xc6   :  { %v169_v54 = vmul.f32 %v406_v52, %v568_v1  ;;  %v408_v57 = vpop.eup %407  ;;  %v128_v4 = vmax.f32 %v102_v2, 1e-24  ;;  %v100_v6 = vpop.xlane.xlu1 %99 }
  0xc7   :  { %v167_v59 = vmul.f32 %v408_v57, %v576_v5  ;;  %v127_v10 = vmax.f32 %v100_v6, 1e-24 }
  0xc8   :  { %361 = vmatpush3.xpose.msra.mxu0 %v169_v54  ;;  %421 = vrsqrt.f32 %v128_v4 }
  0xc9   :  { %362 = vmatprep.subr.mxu0 %v534_v30  ;;  %v410_v61 = vpop.eup %409  ;;  %v98_v11 = vpop.xlane.xlu0 %97  ;;  %423 = vrsqrt.f32 %v127_v10 }
  0xca   :  { %v166_v63 = vmul.f32 %v410_v61, %v582_v8  ;;  %v412_v1 = vpop.eup %411  ;;  %v126_v15 = vmax.f32 %v98_v11, 1e-24  ;;  %v96_v18 = vpop.xlane.xlu1 %95 }
  0xcb   :  { %v165_v3 = vmul.f32 %v412_v1, %v584_v9  ;;  %v125_v22 = vmax.f32 %v96_v18, 1e-24 }
  0xcc   :  { %363 = vmatpush3.xpose.msra.mxu0 %v168_v55  ;;  %425 = vrsqrt.f32 %v126_v15 }
  0xcd   :  { %364 = vmatprep.subr.mxu0 %v534_v30  ;;  %v414_v5 = vpop.eup %413  ;;  %v94_v23 = vpop.xlane.xlu0 %93  ;;  %427 = vrsqrt.f32 %v125_v22 }
  0xce   :  { %v164_v7 = vmul.f32 %v414_v5, %v590_v12  ;;  %v416_v8 = vpop.eup %415  ;;  %v124_v27 = vmax.f32 %v94_v23, 1e-24  ;;  %v92_v31 = vpop.xlane.xlu1 %91 }
  0xcf   :  { %v163_v14 = vmul.f32 %v416_v8, %v592_v13  ;;  %v123_v34 = vmax.f32 %v92_v31, 1e-24 }
  0xd0   :  { %365 = vmatpush3.xpose.msra.mxu0 %v167_v59  ;;  %429 = vrsqrt.f32 %v124_v27 }
  0xd1   :  { %366 = vmatprep.subr.mxu0 %v534_v30  ;;  %v418_v9 = vpop.eup %417  ;;  %431 = vrsqrt.f32 %v123_v34 }
  0xd2   :  { %v162_v19 = vmul.f32 %v418_v9, %v598_v16  ;;  %v420_v12 = vpop.eup %419  ;;  %v71_v16 = vpop.xlane.xlu0 %70 }
  0xd3   :  { %v161_v26 = vmul.f32 %v420_v12, %v600_v17  ;;  %v72_v36 = vmax.f32 %v71_v16, 1e-24 }
  0xd4   :  { %367 = vmatpush3.xpose.msra.mxu0 %v166_v63 }
  0xd5   :  { %368 = vmatprep.subr.mxu0 %v534_v30  ;;  %v422_v13 = vpop.eup %421  ;;  %433 = vrsqrt.f32 %v72_v36 }
  0xd6   :  { %v160_v32 = vmul.f32 %v422_v13, %v606_v20  ;;  %v424_v35 = vpop.eup %423 }
  0xd7   :  { %v159_v37 = vmul.f32 %v424_v35, %v608_v21 }
  0xd8   :  { %369 = vmatpush3.xpose.msra.mxu0 %v165_v3 }
  0xd9   :  { %370 = vmatprep.subr.mxu0 %v534_v30  ;;  %v426_v17 = vpop.eup %425 }
  0xda   :  { %v158_v38 = vmul.f32 %v426_v17, %v614_v24  ;;  %v428_v39 = vpop.eup %427 }
  0xdb   :  { %v157_v20 = vmul.f32 %v428_v39, %v616_v25  ;;  %v242_v25 = vlaneseq }
  0xdc   :  { %371 = vmatpush3.xpose.msra.mxu0 %v164_v7 }
  0xdd   :  { %372 = vmatprep.subr.mxu0 %v534_v30  ;;  %v430_v40 = vpop.eup %429  ;;  %v245_v44 = vshrl.u32 %v242_v25, 7  ;;  %v243_v8 = vand.u32 127, %v242_v25 }
  0xde   :  { %v156_v41 = vmul.f32 %v430_v40, %v622_v28  ;;  %v432_v21 = vpop.eup %431 }
  0xdf   :  { %v155_v43 = vmul.f32 %v432_v21, %v624_v29  ;;  %v266_v45 = vsub.s32 1, %v245_v44  ;;  %v246_v46 = vsub.s32 0, %v245_v44  ;;  %v306_v49 = vsub.s32 3, %v245_v44 }
  0xe0   :  { %373 = vmatpush3.xpose.msra.mxu0 %v163_v14  ;;  %v286_v50 = vsub.s32 2, %v245_v44  ;;  %vm261_vm5 = vcmp.eq.s32.totalorder %v243_v8, 0  ;;  %vm281_vm6 = vcmp.eq.s32.totalorder %v243_v8, 1  ;;  %vm301_vm11 = vcmp.eq.s32.totalorder %v243_v8, 2 }
  0xe1   :  { %374 = vmatprep.subr.mxu0 %v534_v30  ;;  %v267_v48 = vrot.slane %v241_v47, %v266_v45  ;;  %v247_v28 = vrot.slane %v241_v47, %v246_v46  ;;  %v307_v54 = vrot.slane %v241_v47, %v306_v49  ;;  %vm321_vm12 = vcmp.eq.s32.totalorder %v243_v8, 3 }
  0xe2   :  { %v434_v42 = vpop.eup %433  ;;  %v287_v29 = vrot.slane %v241_v47, %v286_v50 }
  0xe3   :  { %v74_v24 = vmul.f32 %v434_v42, %v631_v33 }
  0xe4   :  { %375 = vmatpush3.xpose.msra.mxu0 %v162_v19 }
  0xe5   :  { %376 = vmatprep.subr.mxu0 %v534_v30 }
  0xe8   :  { %377 = vmatpush3.xpose.msra.mxu0 %v161_v26 }
  0xe9   :  { %378 = vmatprep.subr.mxu0 %v534_v30 }
  0xec   :  { %379 = vmatpush3.xpose.msra.mxu0 %v160_v32 }
  0xed   :  { %380 = vmatprep.subr.mxu0 %v534_v30 }
  0xf0   :  { %381 = vmatpush3.xpose.msra.mxu0 %v159_v37 }
  0xf1   :  { %382 = vmatprep.subr.mxu0 %v534_v30 }
  0xf4   :  { %383 = vmatpush3.xpose.msra.mxu0 %v158_v38 }
  0xf5   :  { %384 = vmatprep.subr.mxu0 %v534_v30 }
  0xf8   :  { %385 = vmatpush3.xpose.msra.mxu0 %v157_v20 }
  0xf9   :  { %386 = vmatprep.subr.mxu0 %v534_v30 }
  0xfc   :  { %387 = vmatpush3.xpose.msra.mxu0 %v156_v41 }
  0xfd   :  { %388 = vmatprep.subr.mxu0 %v534_v30 }
 0x100   :  { %389 = vmatpush3.xpose.msra.mxu0 %v155_v43 }
 0x103   :  { %391 = vmatmul.mubr.f32.vlgmr.msra.gmra.mxu0 %v74_v24 }
 0x1c3   :  { %v237_v51 = vpop.f32.mrf.mxu0 }
 0x1c4   :  { %v268_v52 = vadd.f32 %v267_v48, %v237_v51  ;;  %v248_v53 = vadd.f32 %v247_v28, %v237_v51  ;;  %v308_v30 = vadd.f32 %v307_v54, %v237_v51  ;;  %v288_v33 = vadd.f32 %v287_v29, %v237_v51 }
 0x1c5   :  { %v392_v55 = vpop.f32.mrf.mxu0 }
 0x1c6   :  { %269 = vmax.xlane.f32.xlu0 %v268_v52  ;;  %249 = vmax.xlane.f32.xlu1 %v248_v53 }
 0x1ca   :  { %309 = vmax.xlane.f32.xlu0 %v308_v30  ;;  %289 = vmax.xlane.f32.xlu1 %v288_v33 }
 0x24f   :  { %v270_v56 = vpop.xlane.xlu0 %269  ;;  %v250_v57 = vpop.xlane.xlu1 %249 }
 0x250   :  { %v271_v58 = vmul.f32 2.0, %v270_v56  ;;  %v251_v59 = vmul.f32 2.0, %v250_v57 }
 0x252   :  { %v272_v60 = vsub.f32 2.0, %v271_v58  ;;  %v252_v61 = vsub.f32 2.0, %v251_v59 }
 0x253   :  { %v310_v62 = vpop.xlane.xlu0 %309  ;;  %v290_v63 = vpop.xlane.xlu1 %289 }
 0x254   :  { %v273_v0 = vmax.f32 %v272_v60, 0.0  ;;  %v253_v1 = vmax.f32 %v252_v61, 0.0  ;;  %v311_v2 = vmul.f32 2.0, %v310_v62  ;;  %v291_v3 = vmul.f32 2.0, %v290_v63 }
 0x256   :  { %435 = vrsqrt.f32 %v273_v0  ;;  %v312_v4 = vsub.f32 2.0, %v311_v2  ;;  %v292_v5 = vsub.f32 2.0, %v291_v3  ;;  %vm276_vm1 = vcmp.eq.f32.partialorder %v273_v0, inf }
 0x257   :  { %437 = vrsqrt.f32 %v253_v1  ;;  %v279_v9 = vand.u32 2147483648, %v273_v0  ;;  %vm256_vm2 = vcmp.eq.f32.partialorder %v253_v1, inf  ;;  %v259_v18 = vand.u32 2147483648, %v253_v1 }
 0x258   :  { %v313_v6 = vmax.f32 %v312_v4, 0.0  ;;  %v293_v7 = vmax.f32 %v292_v5, 0.0  ;;  %vm278_vm3 = vcmp.eq.f32.partialorder %v273_v0, 0.0  ;;  %vm258_vm4 = vcmp.eq.f32.partialorder %v253_v1, 0.0 }
 0x25a   :  { %439 = vrsqrt.f32 %v313_v6  ;;  %vm296_vm7 = vcmp.eq.f32.partialorder %v293_v7, inf  ;;  %vm316_vm8 = vcmp.eq.f32.partialorder %v313_v6, inf  ;;  %v319_v34 = vand.u32 2147483648, %v313_v6 }
 0x25b   :  { %441 = vrsqrt.f32 %v293_v7  ;;  %v299_v35 = vand.u32 2147483648, %v293_v7  ;;  %vm318_vm9 = vcmp.eq.f32.partialorder %v313_v6, 0.0  ;;  %vm298_vm10 = vcmp.eq.f32.partialorder %v293_v7, 0.0 }
 0x263   :  { %v436_v10 = vpop.eup %435 }
 0x264   :  { %v438_v11 = vpop.eup %437  ;;  %v275_v14 = vmul.f32 %v436_v10, %v273_v0 }
 0x265   :  { %v255_v15 = vmul.f32 %v438_v11, %v253_v1 }
 0x266   :  { %v277_v19 = vsel %vm276_vm1, %v273_v0, %v275_v14 }
 0x267   :  { %v440_v22 = vpop.eup %439  ;;  %v257_v12 = vsel %vm256_vm2, %v253_v1, %v255_v15  ;;  %v280_v23 = vsel %vm278_vm3, %v279_v9, %v277_v19 }
 0x268   :  { %v442_v26 = vpop.eup %441  ;;  %v260_v27 = vsel %vm258_vm4, %v259_v18, %v257_v12  ;;  %v315_v13 = vmul.f32 %v440_v22, %v313_v6  ;;  %v282_v16 = vsub.f32 0.0, %v280_v23 }
 0x269   :  { %v262_v31 = vsub.f32 0.0, %v260_v27  ;;  %v295_v32 = vmul.f32 %v442_v26, %v293_v7 }
 0x26a   :  { %v317_v36 = vsel %vm316_vm8, %v313_v6, %v315_v13 }
 0x26b   :  { %v263_v37 = vsel %vm261_vm5, %v262_v31, 0.0  ;;  %v297_v17 = vsel %vm296_vm7, %v293_v7, %v295_v32  ;;  %v320_v38 = vsel %vm318_vm9, %v319_v34, %v317_v36 }
 0x26c   :  { %v300_v39 = vsel %vm298_vm10, %v299_v35, %v297_v17  ;;  %v322_v20 = vsub.f32 0.0, %v320_v38  ;;  %v283_v41 = vsel %vm281_vm6, %v282_v16, %v263_v37 }
 0x26d   :  { %v302_v40 = vsub.f32 0.0, %v300_v39 }
 0x26f   :  { %v303_v21 = vsel %vm301_vm11, %v302_v40, %v283_v41 }
 0x270   :  { %v323_v42 = vsel %vm321_vm12, %v322_v20, %v303_v21 }
 0x271   :  { %324 = vst [vmem:[#allocation8] sm:$0xff] %v323_v42 }
 0x272   :  { %514 = shalt.err (!%p511_p5)
}
 0x273   :  { %334 = dma.vmem_to_hbm [thread:$0]  %s332_s2, 128, %s675_s3, [#allocation4]  }
 0x274   :  { %527 = dma.done.wait [#allocation4], 128  }
 0x275   :  { %528 = vsyncadd [#allocation4], 4294967168 }
 0x276   :  { %338 = vsyncpa [#allocation3], 1 }
 0x277   :  { %339 = vsyncpa [#allocation6], 1 }
 0x278   :  { %340 = vsyncpa [#allocation4], 1 }

</bundles_post_ra>
